<compile_context>
chip_gen: v7x
topology: tpu7x:2x2x1
jax: 0.10.0
libtpu: 0.0.40
codegen_flags: <defaults>
</compile_context>

<pallas_src>
import functools

import jax
import jax.numpy as jnp
from jax import lax
from jax.experimental import pallas as pl
from jax.experimental.pallas import tpu as pltpu

_LANE = 128
_DEFAULT_MAX_LANE_TILE = 8192          # objects per grid step (multiple of 128)
_DEFAULT_MIN_POINTS_FOR_PALLAS = 16384  # N*K below this -> pure-JAX fast path


def _round_up(x, m):
    return ((x + m - 1) // m) * m


def _make_kernel(loss_type, beta, n_valid, emit_elem):
    """Builds the kernel body. `n_valid` (= N objects) is a static Python int."""

    def _elem_loss(diff):
        # diff = |projected - target| / scale  (non-negative)
        if loss_type in ("l1", "l2"):
            # torch 'l2' is sqrt((a-b)**2) == |a-b| -> identical to 'l1'
            return diff
        elif loss_type == "smooth_l1":
            b = jnp.float32(beta)
            half_over_b = jnp.float32(0.5 / beta)   # static mult, no per-elem divide
            return jnp.where(diff < b, diff * diff * half_over_b, diff - 0.5 * b)
        else:
            raise ValueError(loss_type)

    def _recip(x):
        # EUP approx seed + 2 Newton steps -> full f32 accuracy, frees VALU slots.
        r = pl.reciprocal(x, approx=True)
        r = r * (2.0 - x * r)
        r = r * (2.0 - x * r)
        return r

    def kernel(pts_ref, obj_ref, out_ref):
        i = pl.program_id(0)
        lanes = pts_ref.shape[2]

        x = pts_ref[0]            # (K, L) pred x
        y = pts_ref[1]            # (K, L) pred y
        t0 = pts_ref[2]           # (K, L) target xyz
        t1 = pts_ref[3]
        t2 = pts_ref[4]
        obj = obj_ref[...]        # (11, L) invK rows + scaling + weight

        # validity mask over the (padded) object/lane axis
        lane = lax.broadcasted_iota(jnp.int32, (1, lanes), 1)
        mask = (i * lanes + lane) < n_valid                       # (1, L)

        # ray_direction = invK @ [x, y, 1]^T
        # (1, L) per-object rows broadcast across the K sublanes.
        r0 = obj[0:1] * x + obj[1:2] * y + obj[2:3]
        r1 = obj[3:4] * x + obj[4:5] * y + obj[5:6]
        r2 = obj[6:7] * x + obj[7:8] * y + obj[8:9]
        s = obj[9:10]

        # projection onto the ray: proj = r * (r.t) / (r.r)
        rr = r0 * r0 + r1 * r1 + r2 * r2
        rt = r0 * t0 + r1 * t1 + r2 * t2
        one = jnp.float32(1.0)
        c = rt * _recip(jnp.where(mask, rr, one))
        inv_s = _recip(jnp.where(mask, s, one))

        d0 = jnp.abs(r0 * c - t0) * inv_s
        d1 = jnp.abs(r1 * c - t1) * inv_s
        d2 = jnp.abs(r2 * c - t2) * inv_s

        zero = jnp.float32(0.0)
        l0 = jnp.where(mask, _elem_loss(d0), zero)
        l1 = jnp.where(mask, _elem_loss(d1), zero)
        l2 = jnp.where(mask, _elem_loss(d2), zero)

        if emit_elem:
            # lane-dense, unmasked full-width stores (3 x (K, L) vreg rows)
            out_ref[0] = l0
            out_ref[1] = l1
            out_ref[2] = l2
        else:
            # fused per-object weight + per-tile partial sum -> SMEM
            w = obj[10:11]
            out_ref[0, 0] = jnp.sum((l0 + l1 + l2) * w)

    return kernel


@functools.partial(jax.jit,
                   static_argnames=("loss_type", "beta", "emit_elem",
                                    "max_lane_tile"))
def _object_space_loss_pallas(pred_2d, target_3d, inv_k, scaling, weight1d,
                              loss_type="l1", beta=1.0, emit_elem=False,
                              max_lane_tile=_DEFAULT_MAX_LANE_TILE):
    """Per-element loss (N,K,3) if emit_elem else the (weighted) scalar sum."""
    N, K, _ = pred_2d.shape
    f32 = jnp.float32

    # Stacked per-point slab: (5, K, N) rows = [x, y, tx, ty, tz].
    pts = jnp.concatenate([pred_2d.astype(f32), target_3d.astype(f32)], axis=-1)
    pts = jnp.transpose(pts, (2, 1, 0))                           # (5, K, N)

    # Per-object slab: (11, N) rows = invK(9) + scaling + weight.
    obj = jnp.concatenate([inv_k.reshape(N, 9).astype(f32),
                           scaling.reshape(N, 1).astype(f32),
                           weight1d.reshape(N, 1).astype(f32)], axis=-1).T

    # >= 2 grid steps whenever possible (v7x megacore), capped per-step size.
    lane_tile = max(_LANE,
                    min(int(max_lane_tile), _round_up((N + 1) // 2, _LANE)))
    n_pad = _round_up(N, lane_tile)
    num_tiles = n_pad // lane_tile

    pts = jnp.pad(pts, ((0, 0), (0, 0), (0, n_pad - N)))
    obj = jnp.pad(obj, ((0, 0), (0, n_pad - N)))

    kernel = _make_kernel(loss_type,
                          float(beta) if beta is not None else 1.0,
                          N, emit_elem)

    if emit_elem:
        out_shape = jax.ShapeDtypeStruct((3, K, n_pad), f32)
        out_spec = pl.BlockSpec((3, K, lane_tile), lambda i: (0, 0, i))
        out_bytes = 3 * K * n_pad * 4
    else:
        out_shape = jax.ShapeDtypeStruct((num_tiles, 1), f32)
        out_spec = pl.BlockSpec((1, 1), lambda i: (i, 0),
                                memory_space=pltpu.MemorySpace.SMEM)
        out_bytes = num_tiles * 4

    points = K * n_pad
    cost = pl.CostEstimate(flops=50 * points,
                           transcendentals=2 * points,
                           bytes_accessed=int(pts.size * 4 + obj.size * 4
                                              + out_bytes))

    out = pl.pallas_call(
        kernel,
        out_shape=out_shape,
        grid_spec=pltpu.PrefetchScalarGridSpec(
            num_scalar_prefetch=0,
            grid=(num_tiles,),
            in_specs=[
                pl.BlockSpec((5, K, lane_tile), lambda i: (0, 0, i)),
                pl.BlockSpec((11, lane_tile), lambda i: (0, i)),
            ],
            out_specs=out_spec,
        ),
        compiler_params=pltpu.CompilerParams(
            dimension_semantics=("parallel",),
            # Let XLA fuse the slab prep (concat/transpose/pad) into the
            # Pallas inputs instead of materializing an extra HBM pass.
            allow_input_fusion=[True, True]),
        cost_estimate=cost,
    )(pts, obj)

    if emit_elem:
        return jnp.transpose(out[:, :, :N], (2, 1, 0))            # (N, K, 3)
    return jnp.sum(out)                                           # scalar sum


def _object_space_loss_jax_elem(pred_2d, target_3d, inv_k, scaling,
                                loss_type, beta):
    """Pure-JAX elementwise formulation (small-N fast path and test oracle).

    Written without matmuls so it stays exact f32 regardless of the backend's
    default matmul precision.
    """
    f32 = jnp.float32
    pred_2d = pred_2d.astype(f32)
    target_3d = target_3d.astype(f32)
    inv_k = inv_k.astype(f32)
    scaling = scaling.astype(f32)
    N, K, _ = pred_2d.shape
    p = jnp.concatenate([pred_2d, jnp.ones((N, K, 1), f32)], axis=-1)  # (N,K,3)
    # ray[n,k,i] = sum_j invK[n,i,j] * p[n,k,j]
    ray = jnp.sum(inv_k[:, None, :, :] * p[:, :, None, :], axis=-1)    # (N,K,3)
    rr = jnp.sum(ray * ray, axis=-1, keepdims=True)
    rt = jnp.sum(ray * target_3d, axis=-1, keepdims=True)
    proj = ray * (rt / rr)
    inv_s = 1.0 / scaling[:, None, None]
    d = jnp.abs(proj - target_3d) * inv_s
    if loss_type in ("l1", "l2"):
        return d
    return jnp.where(d < beta, d * d * (0.5 / beta), d - 0.5 * beta)


def _weight_reduce_loss(loss, weight, reduction, avg_factor):
    """Mirror of mmdet's weight_reduce_loss for the (N,K,3) element loss."""
    if weight is not None:
        w = weight
        if w.ndim == 1:
            w = w.reshape(-1, 1, 1)
        elif w.ndim == 2 and w.shape[1] == loss.shape[1]:
            w = w.reshape(w.shape[0], w.shape[1], 1)
        # TODO(synk): (N, keypoint_num*2)-shaped 2D-coordinate weights have no
        # well-defined broadcast against the (N, K, 3) object-space loss.
        loss = loss * w
    if avg_factor is None:
        if reduction == "mean":
            return jnp.mean(loss)
        if reduction == "sum":
            return jnp.sum(loss)
        return loss
    if reduction == "mean":
        return jnp.sum(loss) / avg_factor
    if reduction == "none":
        return loss
    raise ValueError('avg_factor can not be used with reduction="sum"')


class ObjectSpaceLoss:
    """JAX/Pallas port of the PyTorch ObjectSpaceLoss forward pass."""

    def __init__(self, mesh_diameters, loss_weight=1.0, reduction="mean",
                 loss_type="l1", beta=None,
                 max_lane_tile=_DEFAULT_MAX_LANE_TILE,
                 min_points_for_pallas=_DEFAULT_MIN_POINTS_FOR_PALLAS):
        self.mesh_diameters = jnp.asarray(mesh_diameters, jnp.float32).reshape(-1)
        self.loss_weight = float(loss_weight)
        self.reduction = reduction
        assert loss_type in ["smooth_l1", "l1", "l2"]
        if loss_type == "smooth_l1":
            assert isinstance(beta, float)
        self.beta = beta
        self.loss_type = loss_type
        assert max_lane_tile % _LANE == 0 and max_lane_tile >= _LANE
        self.max_lane_tile = int(max_lane_tile)
        self.min_points_for_pallas = int(min_points_for_pallas)

    def __call__(self, pred, target_3d, label, internel_k,
                 weight=None, avg_factor=None, reduction_override=None,
                 coder=None, anchors=None):
        assert reduction_override in (None, "none", "mean", "sum")
        reduction = reduction_override if reduction_override else self.reduction

        if coder is not None:
            pred = coder.decode(anchors, pred)
        # TODO(synk): when no coder is supplied an identity decode is assumed
        # (pred already in 2D pixel coordinates).

        N, K = pred.shape[0], pred.shape[1]
        if N == 0 or K == 0:
            # empty-target fast path mirrors `pred.sum() * 0`
            return jnp.sum(pred) * 0.0

        target_3d = target_3d.reshape(N, K, 3)
        scaling = self.mesh_diameters[label]
        inv_k = jnp.linalg.inv(internel_k)    # tiny 3x3 batched inverse: JAX glue
        beta = self.beta if self.beta is not None else 1.0

        w = None if weight is None else jnp.asarray(weight, jnp.float32)
        w_fusable = (w is not None) and (w.ndim == 1) and (w.shape[0] == N)

        use_pallas = (N * K) >= self.min_points_for_pallas
        need_elem = (reduction == "none") or (w is not None and not w_fusable)

        if not use_pallas:
            # Small problems: launch overhead + layout prep would dominate the
            # Pallas call; one fused XLA fusion is faster on every generation.
            loss_elem = _object_space_loss_jax_elem(
                pred, target_3d, inv_k, scaling, self.loss_type, beta)
            reduced = _weight_reduce_loss(loss_elem, w, reduction, avg_factor)
        elif need_elem:
            loss_elem = _object_space_loss_pallas(
                pred, target_3d, inv_k, scaling, jnp.ones((N,), jnp.float32),
                loss_type=self.loss_type, beta=beta, emit_elem=True,
                max_lane_tile=self.max_lane_tile)
            reduced = _weight_reduce_loss(loss_elem, w, reduction, avg_factor)
        else:
            # sum-only kernel with fused per-object weight: no per-element HBM
            # write, no re-read for the weight multiply, no output transpose.
            w1d = w if w_fusable else jnp.ones((N,), jnp.float32)
            loss_sum = _object_space_loss_pallas(
                pred, target_3d, inv_k, scaling, w1d,
                loss_type=self.loss_type, beta=beta, emit_elem=False,
                max_lane_tile=self.max_lane_tile)
            if avg_factor is None:
                reduced = loss_sum / (N * K * 3) if reduction == "mean" else loss_sum
            else:
                if reduction == "mean":
                    reduced = loss_sum / avg_factor
                else:
                    raise ValueError(
                        'avg_factor can not be used with reduction="sum"')
        return self.loss_weight * reduced


if __name__ == "__main__":
    key = jax.random.PRNGKey(0)
    k1, k2, k3, k4 = jax.random.split(key, 4)

    N, K = 8, 8                      # 8 predictions, 8 keypoints each
    num_classes = 4
    mesh_diameters = [0.1, 0.25, 0.5, 1.0]

    # deterministic synthetic inputs
    pred = jax.random.uniform(k1, (N, K, 2), jnp.float32, 0.0, 640.0)
    target_3d = jax.random.uniform(k2, (N, K, 3), jnp.float32, -1.0, 1.0)
    target_3d = target_3d.at[..., 2].add(3.0)          # keep z positive
    label = jax.random.randint(k3, (N,), 0, num_classes)

    fx = 500.0 + 10.0 * jax.random.uniform(k4, (N,), jnp.float32)
    fy = fx + 1.5
    cx = jnp.full((N,), 320.0, jnp.float32)
    cy = jnp.full((N,), 240.0, jnp.float32)
    zeros = jnp.zeros((N,), jnp.float32)
    ones = jnp.ones((N,), jnp.float32)
    internel_k = jnp.stack(
        [jnp.stack([fx, zeros, cx], -1),
         jnp.stack([zeros, fy, cy], -1),
         jnp.stack([zeros, zeros, ones], -1)], axis=1)   # (N, 3, 3)

    # min_points_for_pallas=0 forces the Pallas path at these tiny test sizes
    # (the default threshold would route them to the pure-JAX fast path).
    loss_l1 = ObjectSpaceLoss(mesh_diameters, loss_weight=1.0, reduction="mean",
                              loss_type="l1", min_points_for_pallas=0)

    inv_k_ref = jnp.linalg.inv(internel_k)
    diam = loss_l1.mesh_diameters[label]
    ref_elem = _object_space_loss_jax_elem(pred, target_3d, inv_k_ref, diam,
                                           "l1", 1.0)

    # 1) mean reduction, no weight -> sum-only kernel path
    out_mean = jax.block_until_ready(loss_l1(pred, target_3d, label, internel_k))
    assert jnp.allclose(out_mean, jnp.mean(ref_elem), rtol=1e-4, atol=1e-6), \
        (out_mean, jnp.mean(ref_elem))

    # 2) reduction='none' -> per-element kernel path
    out_none = jax.block_until_ready(
        loss_l1(pred, target_3d, label, internel_k, reduction_override="none"))
    assert out_none.shape == (N, K, 3)
    assert jnp.allclose(out_none, ref_elem, rtol=2e-4, atol=5e-5), \
        float(jnp.max(jnp.abs(out_none - ref_elem)))

    # 3) per-object weight fused into the sum-only kernel (mean reduction)
    wobj = jax.random.uniform(jax.random.PRNGKey(5), (N,), jnp.float32, 0.5, 1.5)
    out_wmean = jax.block_until_ready(
        loss_l1(pred, target_3d, label, internel_k, weight=wobj))
    ref_wmean = jnp.mean(ref_elem * wobj[:, None, None])
    assert jnp.allclose(out_wmean, ref_wmean, rtol=1e-4, atol=1e-6), \
        (out_wmean, ref_wmean)

    # 4) small-N pure-JAX fast path (default threshold) matches the Pallas path
    loss_fast = ObjectSpaceLoss(mesh_diameters, loss_weight=1.0,
                                reduction="mean", loss_type="l1")
    out_fast = jax.block_until_ready(loss_fast(pred, target_3d, label, internel_k))
    assert jnp.allclose(out_fast, out_mean, rtol=1e-4, atol=1e-6), \
        (out_fast, out_mean)

    # 5) smooth_l1, sum reduction, multi-tile + lane-mask path
    #    (200 objects, 128-lane tiles -> 2 grid steps, last tile padded)
    N2 = 200
    kk = jax.random.split(jax.random.PRNGKey(1), 3)
    pred2 = jax.random.uniform(kk[0], (N2, K, 2), jnp.float32, 0.0, 640.0)
    t2 = jax.random.uniform(kk[1], (N2, K, 3), jnp.float32, -1.0, 1.0)
    t2 = t2.at[..., 2].add(3.0)
    label2 = jax.random.randint(kk[2], (N2,), 0, num_classes)
    internel_k2 = jnp.tile(internel_k[:1], (N2, 1, 1))

    loss_sl1 = ObjectSpaceLoss(mesh_diameters, loss_weight=1.0, reduction="sum",
                               loss_type="smooth_l1", beta=0.2,
                               max_lane_tile=128, min_points_for_pallas=0)
    out_sum = jax.block_until_ready(loss_sl1(pred2, t2, label2, internel_k2))
    ref2 = _object_space_loss_jax_elem(pred2, t2, jnp.linalg.inv(internel_k2),
                                       loss_sl1.mesh_diameters[label2],
                                       "smooth_l1", 0.2)
    assert jnp.allclose(out_sum, jnp.sum(ref2), rtol=1e-4, atol=1e-3), \
        (out_sum, jnp.sum(ref2))

    print("KERNEL_OK")
</pallas_src>

<mosaic_0001>
module attributes {stable_mosaic.version = 11 : i64} {
  func.func @kernel(%arg0: i32, %arg1: memref<5x8x128xf32, #tpu.memory_space<vmem>>, %arg2: memref<11x128xf32, #tpu.memory_space<vmem>>, %arg3: memref<1x1xf32, #tpu.memory_space<smem>>) attributes {dimension_semantics = [#tpu.dimension_semantics<parallel>], iteration_bounds = array<i64: 1>, scalar_prefetch = 0 : i64, scratch_operands = 0 : i64, tpu.core_type = #tpu.core_type<tc>, window_params = [{transform_indices = @transform_0, window_bounds = array<i64: 5, 8, 128>}, {transform_indices = @transform_1, window_bounds = array<i64: 11, 128>}, {transform_indices = @transform_2, window_bounds = array<i64: 1, 1>}]} {
    %c0 = arith.constant 0 : index
    %c0_0 = arith.constant 0 : index
    %c0_1 = arith.constant 0 : index
    %0 = vector.load %arg1[%c0, %c0_0, %c0_1] : memref<5x8x128xf32, #tpu.memory_space<vmem>>, vector<1x8x128xf32>
    %1 = vector.shape_cast %0 : vector<1x8x128xf32> to vector<8x128xf32>
    %c1 = arith.constant 1 : index
    %c0_2 = arith.constant 0 : index
    %c0_3 = arith.constant 0 : index
    %2 = vector.load %arg1[%c1, %c0_2, %c0_3] : memref<5x8x128xf32, #tpu.memory_space<vmem>>, vector<1x8x128xf32>
    %3 = vector.shape_cast %2 : vector<1x8x128xf32> to vector<8x128xf32>
    %c2 = arith.constant 2 : index
    %c0_4 = arith.constant 0 : index
    %c0_5 = arith.constant 0 : index
    %4 = vector.load %arg1[%c2, %c0_4, %c0_5] : memref<5x8x128xf32, #tpu.memory_space<vmem>>, vector<1x8x128xf32>
    %5 = vector.shape_cast %4 : vector<1x8x128xf32> to vector<8x128xf32>
    %c3 = arith.constant 3 : index
    %c0_6 = arith.constant 0 : index
    %c0_7 = arith.constant 0 : index
    %6 = vector.load %arg1[%c3, %c0_6, %c0_7] : memref<5x8x128xf32, #tpu.memory_space<vmem>>, vector<1x8x128xf32>
    %7 = vector.shape_cast %6 : vector<1x8x128xf32> to vector<8x128xf32>
    %c4 = arith.constant 4 : index
    %c0_8 = arith.constant 0 : index
    %c0_9 = arith.constant 0 : index
    %8 = vector.load %arg1[%c4, %c0_8, %c0_9] : memref<5x8x128xf32, #tpu.memory_space<vmem>>, vector<1x8x128xf32>
    %9 = vector.shape_cast %8 : vector<1x8x128xf32> to vector<8x128xf32>
    %c0_10 = arith.constant 0 : index
    %c0_11 = arith.constant 0 : index
    %10 = vector.load %arg2[%c0_10, %c0_11] : memref<11x128xf32, #tpu.memory_space<vmem>>, vector<11x128xf32>
    %11 = tpu.iota {dimensions = array<i32: 1>} : vector<1x128xi32>
    %c128_i32 = arith.constant 128 : i32
    %12 = arith.muli %arg0, %c128_i32 : i32
    %13 = vector.broadcast %12 : i32 to vector<1x128xi32>
    %14 = arith.addi %13, %11 : vector<1x128xi32>
    %c8_i32 = arith.constant 8 : i32
    %15 = vector.broadcast %c8_i32 : i32 to vector<1x128xi32>
    %16 = arith.cmpi slt, %14, %15 : vector<1x128xi32>
    %17 = vector.extract_strided_slice %10 {offsets = [0, 0], sizes = [1, 128], strides = [1, 1]} : vector<11x128xf32> to vector<1x128xf32>
    %18 = vector.broadcast %17 : vector<1x128xf32> to vector<8x128xf32>
    %19 = arith.mulf %18, %1 : vector<8x128xf32>
    %20 = vector.extract_strided_slice %10 {offsets = [1, 0], sizes = [1, 128], strides = [1, 1]} : vector<11x128xf32> to vector<1x128xf32>
    %21 = vector.broadcast %20 : vector<1x128xf32> to vector<8x128xf32>
    %22 = arith.mulf %21, %3 : vector<8x128xf32>
    %23 = arith.addf %19, %22 : vector<8x128xf32>
    %24 = vector.extract_strided_slice %10 {offsets = [2, 0], sizes = [1, 128], strides = [1, 1]} : vector<11x128xf32> to vector<1x128xf32>
    %25 = vector.broadcast %24 : vector<1x128xf32> to vector<8x128xf32>
    %26 = arith.addf %23, %25 : vector<8x128xf32>
    %27 = vector.extract_strided_slice %10 {offsets = [3, 0], sizes = [1, 128], strides = [1, 1]} : vector<11x128xf32> to vector<1x128xf32>
    %28 = vector.broadcast %27 : vector<1x128xf32> to vector<8x128xf32>
    %29 = arith.mulf %28, %1 : vector<8x128xf32>
    %30 = vector.extract_strided_slice %10 {offsets = [4, 0], sizes = [1, 128], strides = [1, 1]} : vector<11x128xf32> to vector<1x128xf32>
    %31 = vector.broadcast %30 : vector<1x128xf32> to vector<8x128xf32>
    %32 = arith.mulf %31, %3 : vector<8x128xf32>
    %33 = arith.addf %29, %32 : vector<8x128xf32>
    %34 = vector.extract_strided_slice %10 {offsets = [5, 0], sizes = [1, 128], strides = [1, 1]} : vector<11x128xf32> to vector<1x128xf32>
    %35 = vector.broadcast %34 : vector<1x128xf32> to vector<8x128xf32>
    %36 = arith.addf %33, %35 : vector<8x128xf32>
    %37 = vector.extract_strided_slice %10 {offsets = [6, 0], sizes = [1, 128], strides = [1, 1]} : vector<11x128xf32> to vector<1x128xf32>
    %38 = vector.broadcast %37 : vector<1x128xf32> to vector<8x128xf32>
    %39 = arith.mulf %38, %1 : vector<8x128xf32>
    %40 = vector.extract_strided_slice %10 {offsets = [7, 0], sizes = [1, 128], strides = [1, 1]} : vector<11x128xf32> to vector<1x128xf32>
    %41 = vector.broadcast %40 : vector<1x128xf32> to vector<8x128xf32>
    %42 = arith.mulf %41, %3 : vector<8x128xf32>
    %43 = arith.addf %39, %42 : vector<8x128xf32>
    %44 = vector.extract_strided_slice %10 {offsets = [8, 0], sizes = [1, 128], strides = [1, 1]} : vector<11x128xf32> to vector<1x128xf32>
    %45 = vector.broadcast %44 : vector<1x128xf32> to vector<8x128xf32>
    %46 = arith.addf %43, %45 : vector<8x128xf32>
    %47 = vector.extract_strided_slice %10 {offsets = [9, 0], sizes = [1, 128], strides = [1, 1]} : vector<11x128xf32> to vector<1x128xf32>
    %48 = arith.mulf %26, %26 : vector<8x128xf32>
    %49 = arith.mulf %36, %36 : vector<8x128xf32>
    %50 = arith.addf %48, %49 : vector<8x128xf32>
    %51 = arith.mulf %46, %46 : vector<8x128xf32>
    %52 = arith.addf %50, %51 : vector<8x128xf32>
    %53 = arith.mulf %26, %5 : vector<8x128xf32>
    %54 = arith.mulf %36, %7 : vector<8x128xf32>
    %55 = arith.addf %53, %54 : vector<8x128xf32>
    %56 = arith.mulf %46, %9 : vector<8x128xf32>
    %57 = arith.addf %55, %56 : vector<8x128xf32>
    %cst = arith.constant 1.000000e+00 : f32
    %58 = vector.shape_cast %16 : vector<1x128xi1> to vector<1x128xi1>
    %59 = vector.broadcast %58 : vector<1x128xi1> to vector<8x128xi1>
    %60 = vector.broadcast %cst : f32 to vector<8x128xf32>
    %61 = arith.select %59, %52, %60 : vector<8x128xi1>, vector<8x128xf32>
    %62 = tpu.reciprocal %61 {approx = true} : vector<8x128xf32> -> vector<8x128xf32>
    %63 = arith.mulf %61, %62 : vector<8x128xf32>
    %cst_12 = arith.constant 2.000000e+00 : f32
    %64 = vector.broadcast %cst_12 : f32 to vector<8x128xf32>
    %65 = arith.subf %64, %63 : vector<8x128xf32>
    %66 = arith.mulf %62, %65 : vector<8x128xf32>
    %67 = arith.mulf %61, %66 : vector<8x128xf32>
    %cst_13 = arith.constant 2.000000e+00 : f32
    %68 = vector.broadcast %cst_13 : f32 to vector<8x128xf32>
    %69 = arith.subf %68, %67 : vector<8x128xf32>
    %70 = arith.mulf %66, %69 : vector<8x128xf32>
    %71 = arith.mulf %57, %70 : vector<8x128xf32>
    %cst_14 = arith.constant 1.000000e+00 : f32
    %72 = vector.broadcast %cst_14 : f32 to vector<1x128xf32>
    %73 = arith.select %16, %47, %72 : vector<1x128xi1>, vector<1x128xf32>
    %74 = tpu.reciprocal %73 {approx = true} : vector<1x128xf32> -> vector<1x128xf32>
    %75 = arith.mulf %73, %74 : vector<1x128xf32>
    %cst_15 = arith.constant 2.000000e+00 : f32
    %76 = vector.broadcast %cst_15 : f32 to vector<1x128xf32>
    %77 = arith.subf %76, %75 : vector<1x128xf32>
    %78 = arith.mulf %74, %77 : vector<1x128xf32>
    %79 = arith.mulf %73, %78 : vector<1x128xf32>
    %cst_16 = arith.constant 2.000000e+00 : f32
    %80 = vector.broadcast %cst_16 : f32 to vector<1x128xf32>
    %81 = arith.subf %80, %79 : vector<1x128xf32>
    %82 = arith.mulf %78, %81 : vector<1x128xf32>
    %83 = arith.mulf %26, %71 : vector<8x128xf32>
    %84 = arith.subf %83, %5 : vector<8x128xf32>
    %85 = math.absf %84 : vector<8x128xf32>
    %86 = vector.broadcast %82 : vector<1x128xf32> to vector<8x128xf32>
    %87 = arith.mulf %85, %86 : vector<8x128xf32>
    %88 = arith.mulf %36, %71 : vector<8x128xf32>
    %89 = arith.subf %88, %7 : vector<8x128xf32>
    %90 = math.absf %89 : vector<8x128xf32>
    %91 = vector.broadcast %82 : vector<1x128xf32> to vector<8x128xf32>
    %92 = arith.mulf %90, %91 : vector<8x128xf32>
    %93 = arith.mulf %46, %71 : vector<8x128xf32>
    %94 = arith.subf %93, %9 : vector<8x128xf32>
    %95 = math.absf %94 : vector<8x128xf32>
    %96 = vector.broadcast %82 : vector<1x128xf32> to vector<8x128xf32>
    %97 = arith.mulf %95, %96 : vector<8x128xf32>
    %cst_17 = arith.constant 0.000000e+00 : f32
    %98 = vector.shape_cast %16 : vector<1x128xi1> to vector<1x128xi1>
    %99 = vector.broadcast %98 : vector<1x128xi1> to vector<8x128xi1>
    %100 = vector.broadcast %cst_17 : f32 to vector<8x128xf32>
    %101 = arith.select %99, %87, %100 : vector<8x128xi1>, vector<8x128xf32>
    %cst_18 = arith.constant 0.000000e+00 : f32
    %102 = vector.shape_cast %16 : vector<1x128xi1> to vector<1x128xi1>
    %103 = vector.broadcast %102 : vector<1x128xi1> to vector<8x128xi1>
    %104 = vector.broadcast %cst_18 : f32 to vector<8x128xf32>
    %105 = arith.select %103, %92, %104 : vector<8x128xi1>, vector<8x128xf32>
    %cst_19 = arith.constant 0.000000e+00 : f32
    %106 = vector.shape_cast %16 : vector<1x128xi1> to vector<1x128xi1>
    %107 = vector.broadcast %106 : vector<1x128xi1> to vector<8x128xi1>
    %108 = vector.broadcast %cst_19 : f32 to vector<8x128xf32>
    %109 = arith.select %107, %97, %108 : vector<8x128xi1>, vector<8x128xf32>
    %110 = vector.extract_strided_slice %10 {offsets = [10, 0], sizes = [1, 128], strides = [1, 1]} : vector<11x128xf32> to vector<1x128xf32>
    %111 = arith.addf %101, %105 : vector<8x128xf32>
    %112 = arith.addf %111, %109 : vector<8x128xf32>
    %113 = vector.broadcast %110 : vector<1x128xf32> to vector<8x128xf32>
    %114 = arith.mulf %112, %113 : vector<8x128xf32>
    %115 = vector.shape_cast %114 : vector<8x128xf32> to vector<1x8x128xf32>
    %cst_20 = arith.constant dense<0.000000e+00> : vector<1xf32>
    %116 = vector.multi_reduction <add>, %115, %cst_20 [1, 2] : vector<1x8x128xf32> to vector<1xf32>
    %117 = vector.shape_cast %116 : vector<1xf32> to vector<1x1x1xf32>
    %118 = vector.extract %117[0, 0, 0] : f32 from vector<1x1x1xf32>
    %c0_21 = arith.constant 0 : index
    %c0_22 = arith.constant 0 : index
    %119 = memref.load %arg3[%c0_21, %c0_22] : memref<1x1xf32, #tpu.memory_space<smem>>
    memref.store %118, %arg3[%c0_21, %c0_22] : memref<1x1xf32, #tpu.memory_space<smem>>
    return
  }
  func.func @transform_0(%arg0: i32) -> (i32, i32, i32) {
    %c0_i32 = arith.constant 0 : i32
    %c0_i32_0 = arith.constant 0 : i32
    %c0_i32_1 = arith.constant 0 : i32
    return %c0_i32, %c0_i32_0, %arg0 : i32, i32, i32
  }
  func.func @transform_1(%arg0: i32) -> (i32, i32) {
    %c0_i32 = arith.constant 0 : i32
    %c0_i32_0 = arith.constant 0 : i32
    return %c0_i32, %arg0 : i32, i32
  }
  func.func @transform_2(%arg0: i32) -> (i32, i32) {
    %c0_i32 = arith.constant 0 : i32
    %c0_i32_0 = arith.constant 0 : i32
    return %arg0, %c0_i32 : i32, i32
  }
}

</mosaic_0001>

<bundles_post_ra>
// kernel: _object_space_loss_pallas.2
= control target key start
LH: loop header
LB: loop body
LE: loop exit
PB: predicated region body
PF: predicated region fallthrough
CT: control target
= control target key end

     0   :  { %s372_s0 = inlined_call_operand.vmem [shape: f32[5,8,8], index: 0, kind: input, shape index: {}]   ;;  %s373_s1 = inlined_call_operand.<no memory space> [shape: f32[], index: 1, kind: input, shape index: {}]   ;;  %s374_s2 = inlined_call_operand.vmem [shape: f32[11,8], index: 2, kind: input, shape index: {}]   ;;  %s375_s3 = inlined_call_operand.hbm [shape: f32[1,1], index: 3, kind: output, shape index: {}]  }
   0x1   :  { %v283_v0 = vstv %s373_s1 }
   0x2   :  { %v16_v1 = vlaneseq  ;;  %v15_v2 = vld [vmem:[%s372_s0] sm:$0xff] }
   0x4   :  { %v288_v3 = vand.u32 127, %v16_v1  ;;  %v290_v4 = vshrl.u32 %v16_v1, 7 }
   0x5   :  { %10 = vsyncpa [#allocation13], 0  ;;  %v235_v5 = vld [vmem:[%s372_s0 + $0x8] sm:$0xff]  ;;  %v63_v6 = vld [vmem:[%s374_s2] sm:$0xff]  ;;  %s247_s28 = scalar_lea.hbm %s375_s3, 16 }
   0x6   :  { %vm19_vm0 = vcmp.lt.s32.totalorder %v288_v3, 8  ;;  %v239_v7 = vld [vmem:[%s374_s2 + $0x8] sm:$0xff]  ;;  %v80_v8 = vadd.s32 8, %v290_v4  ;;  %v110_v9 = vsub.s32 0, %v290_v4  ;;  %v115_v10 = vsub.s32 1, %v290_v4  ;;  %v236_v53 = vld [vmem:[%s372_s0 + $0x10] sm:$0xff]  ;;  %p248_p0 = scmp.ne.s32.totalorder %s375_s3, %s247_s28  ;;  %p251_p1 = scmp.lt.u32.totalorder %s247_s28, %s375_s3 }
   0x7   :  { %v20_v11 = vsel %vm19_vm0, %v15_v2, %v283_v0  ;;  %v29_v12 = vsel %vm19_vm0, %v235_v5, %v283_v0  ;;  %v73_v13 = vsel %vm19_vm0, %v63_v6, %v283_v0  ;;  %v121_v14 = vsub.s32 2, %v290_v4  ;;  %v237_v54 = vld [vmem:[%s372_s0 + $0x18] sm:$0xff]  ;;  %v238_v58 = vld [vmem:[%s372_s0 + $0x20] sm:$0xff] }
   0x8   :  { %vm81_vm1 = vcmp.lt.s32.totalorder %v80_v8, 11  ;;  %v111_v16 = vrot.slane %v73_v13, %v110_v9  ;;  %v116_v17 = vrot.slane %v73_v13, %v115_v10  ;;  %v126_v18 = vsub.s32 3, %v290_v4  ;;  %p253_p2 = pnand %p251_p1, %p248_p0 }
   0x9   :  { %v82_v15 = vsel %vm81_vm1, %v239_v7, %v283_v0  ;;  %v122_v20 = vrot.slane %v73_v13, %v121_v14  ;;  %v131_v21 = vsub.s32 4, %v290_v4  ;;  %v137_v22 = vsub.s32 5, %v290_v4 }
   0xa   :  { %v87_v19 = vsel %vm19_vm0, %v82_v15, %v283_v0  ;;  %v112_v23 = vmul.f32 %v111_v16, %v20_v11  ;;  %v117_v24 = vmul.f32 %v116_v17, %v29_v12  ;;  %v127_v25 = vrot.slane %v73_v13, %v126_v18 }
   0xb   :  { %90 = vst [vmem:[#allocation15 + $0x8] sm:$0xff] %v87_v19  ;;  %v142_v26 = vsub.s32 6, %v290_v4  ;;  %v132_v27 = vrot.slane %v73_v13, %v131_v21  ;;  %v147_v28 = vsub.s32 7, %v290_v4  ;;  %v138_v33 = vrot.slane %v73_v13, %v137_v22 }
   0xc   :  { %v118_v29 = vadd.f32 %v117_v24, %v112_v23  ;;  %v128_v30 = vmul.f32 %v127_v25, %v20_v11  ;;  %v39_v56 = vsel %vm19_vm0, %v236_v53, %v283_v0  ;;  %v49_v57 = vsel %vm19_vm0, %v237_v54, %v283_v0 }
   0xd   :  { %v143_v31 = vrot.slane %v73_v13, %v142_v26  ;;  %v133_v32 = vmul.f32 %v132_v27, %v29_v12  ;;  %v148_v34 = vrot.slane %v73_v13, %v147_v28  ;;  %v59_v1 = vsel %vm19_vm0, %v238_v58, %v283_v0 }
   0xe   :  { %v123_v35 = vadd.f32 %v122_v20, %v118_v29 }
   0xf   :  { %v144_v36 = vmul.f32 %v143_v31, %v20_v11  ;;  %v134_v37 = vadd.f32 %v133_v32, %v128_v30  ;;  %v149_v38 = vmul.f32 %v148_v34, %v29_v12 }
  0x10   :  { %v156_v42 = vmul.f32 %v123_v35, %v123_v35  ;;  %v161_v60 = vmul.f32 %v123_v35, %v39_v56 }
  0x11   :  { %v139_v40 = vadd.f32 %v138_v33, %v134_v37  ;;  %v150_v41 = vadd.f32 %v149_v38, %v144_v36 }
  0x12   :  { %v101_v39 = vld [vmem:[#allocation15 + $0x8] sm:$0x7] }
  0x13   :  { %v154_v43 = vrot.slane %v101_v39, %v110_v9  ;;  %v177_v44 = vsel %vm19_vm0, %v101_v39, 1.0  ;;  %v157_v45 = vmul.f32 %v139_v40, %v139_v40  ;;  %v162_v61 = vmul.f32 %v139_v40, %v49_v57 }
  0x14   :  { %243 = vrcp.f32 %v177_v44 }
  0x15   :  { %v155_v46 = vadd.f32 %v154_v43, %v150_v41  ;;  %v158_v47 = vadd.f32 %v157_v45, %v156_v42  ;;  %v163_v5 = vadd.f32 %v162_v61, %v161_v60 }
  0x17   :  { %v159_v48 = vmul.f32 %v155_v46, %v155_v46  ;;  %v164_v6 = vmul.f32 %v155_v46, %v59_v1 }
  0x19   :  { %v160_v49 = vadd.f32 %v159_v48, %v158_v47  ;;  %v165_v11 = vadd.f32 %v164_v6, %v163_v5 }
  0x1b   :  { %v168_v50 = vsel %vm19_vm0, %v160_v49, 1.0 }
  0x1c   :  { %245 = vrcp.f32 %v168_v50 }
  0x1e   :  { %v244_v51 = vpop.eup %243 }
  0x1f   :  { %v179_v52 = vmul.f32 %v244_v51, %v177_v44 }
  0x21   :  { %v180_v55 = vsub.f32 2.0, %v179_v52 }
  0x23   :  { %v181_v63 = vmul.f32 %v244_v51, %v180_v55 }
  0x25   :  { %v182_v8 = vmul.f32 %v181_v63, %v177_v44 }
  0x26   :  { %v246_v59 = vpop.eup %245 }
  0x27   :  { %v170_v62 = vmul.f32 %v246_v59, %v168_v50  ;;  %v183_v13 = vsub.f32 2.0, %v182_v8 }
  0x29   :  { %v171_v2 = vsub.f32 2.0, %v170_v62  ;;  %v184_v17 = vmul.f32 %v183_v13, %v181_v63 }
  0x2b   :  { %v172_v7 = vmul.f32 %v246_v59, %v171_v2  ;;  %v191_v22 = vrot.slane %v184_v17, %v115_v10  ;;  %v209_v10 = vrot.slane %v101_v39, %v121_v14 }
  0x2d   :  { %v173_v9 = vmul.f32 %v172_v7, %v168_v50 }
  0x2f   :  { %v174_v12 = vsub.f32 2.0, %v173_v9 }
  0x31   :  { %v175_v15 = vmul.f32 %v174_v12, %v172_v7 }
  0x33   :  { %v176_v16 = vmul.f32 %v175_v15, %v165_v11 }
  0x35   :  { %v185_v18 = vmul.f32 %v176_v16, %v123_v35  ;;  %v193_v19 = vmul.f32 %v176_v16, %v139_v40  ;;  %v197_v20 = vmul.f32 %v176_v16, %v155_v46 }
  0x37   :  { %v186_v21 = vsub.f32 %v185_v18, %v39_v56  ;;  %v194_v0 = vsub.f32 %v193_v19, %v49_v57  ;;  %v198_v23 = vsub.f32 %v197_v20, %v59_v1 }
  0x39   :  { %v187_v24 = vand.u32 2147483647, %v186_v21  ;;  %v195_v25 = vand.u32 2147483647, %v194_v0  ;;  %v199_v26 = vand.u32 2147483647, %v198_v23 }
  0x3b   :  { %v192_v27 = vmul.f32 %v191_v22, %v187_v24  ;;  %v196_v28 = vmul.f32 %v195_v25, %v191_v22  ;;  %v200_v29 = vmul.f32 %v199_v26, %v191_v22 }
  0x3d   :  { %v201_v30 = vsel %vm19_vm0, %v192_v27, 0.0  ;;  %v202_v31 = vsel %vm19_vm0, %v196_v28, 0.0  ;;  %v203_v32 = vsel %vm19_vm0, %v200_v29, 0.0 }
  0x3e   :  { %v204_v33 = vadd.f32 %v202_v31, %v201_v30 }
  0x40   :  { %v205_v34 = vadd.f32 %v204_v33, %v203_v32 }
  0x42   :  { %v210_v35 = vmul.f32 %v209_v10, %v205_v34 }
  0x44   :  { %211 = vadd.xlane.f32.xlu0 %v210_v35 }
  0xd1   :  { %v212_v36 = vpop.xlane.xlu0 %211 }
  0xd2   :  { %v213_v37 = vrot.slane %v212_v36, 4 }
  0xd4   :  { %v214_v38 = vadd.f32 %v213_v37, %v212_v36 }
  0xd6   :  { %v215_v40 = vrot.slane %v214_v38, 2 }
  0xd8   :  { %v216_v41 = vadd.f32 %v215_v40, %v214_v38 }
  0xda   :  { %v217_v42 = vrot.slane %v216_v41, 1 }
  0xdc   :  { %v218_v43 = vadd.f32 %v217_v42, %v216_v41 }
  0xde   :  { %240 = vpush %v218_v43 }
 0x10f   :  { %s241_s0 = spop %240 }
 0x110   :  { %221 = sst [smem:[#allocation12]] %s241_s0 }
 0x111   :  { %256 = shalt.err (!%p253_p2)
}
 0x112   :  { %s259_s6 = smov [#allocation12]  }
 0x113   :  { %229 = dma.smem_to_hbm %s259_s6, 16, %s375_s3, [#allocation13]  }
 0x114   :  { %257 = dma.done.wait [#allocation13], 16  }
 0x115   :  { %258 = vsyncadd [#allocation13], 4294967280 }
 0x116   :  { %233 = sfence }
 0x117   :  { %234 = vsyncpa [#allocation13], 1 }

</bundles_post_ra>
